<compile_context>
chip_gen: v7x
topology: tpu7x:2x2x1
jax: 0.10.0
libtpu: 0.0.40
codegen_flags: <defaults>
</compile_context>

<pallas_src>
import functools
import math

import jax
import jax.numpy as jnp
from jax.experimental import pallas as pl
from jax.experimental.pallas import tpu as pltpu


_VMEM_LIMIT_BYTES = 64 * 1024 * 1024      # explicit scoped-VMEM limit (fits v7x physical)
_VMEM_BUDGET_BYTES = 48 * 1024 * 1024     # target working-set budget (headroom inside limit)


def _round_up(n, m):
    return ((n + m - 1) // m) * m


# --------------------------------------------------------------------------
# Kernel
# --------------------------------------------------------------------------
def encoder_kernel(x_ref, w0_ref, b0_ref, w1_ref, b1_ref,
                   wh_ref, bh_ref, eps_ref, out_ref, *, lpad):
    x = x_ref[...]

    # MLP block1: Linear + ReLU   (operands cast to weight dtype; f32 accumulate)
    h = jnp.dot(x.astype(w0_ref.dtype), w0_ref[...],
                preferred_element_type=jnp.float32) + b0_ref[...]
    h = jnp.maximum(h, 0.0)

    # MLP block2: Linear + ReLU
    h = jnp.dot(h.astype(w1_ref.dtype), w1_ref[...],
                preferred_element_type=jnp.float32) + b1_ref[...]
    h = jnp.maximum(h, 0.0)

    # Fused heads: one matmul produces [mu | pre_logvar], each lane-padded to
    # a multiple of 128 so both slices below are vreg-lane aligned.
    head = jnp.dot(h.astype(wh_ref.dtype), wh_ref[...],
                   preferred_element_type=jnp.float32) + bh_ref[...]
    mu = head[:, :lpad]
    pre = head[:, lpad:]

    # Numerically stable softplus, then sigma = exp(softplus(pre) / 2)
    log_var = jnp.maximum(pre, 0.0) + jnp.log1p(jnp.exp(-jnp.abs(pre)))
    sigma = jnp.exp(log_var * 0.5)

    # Reparameterization (eps is lane-padded to lpad in the wrapper)
    z = mu + sigma * eps_ref[...]

    # Single lane-dense (multiple-of-128) output slab: [z | mu | sigma]
    out_ref[...] = jnp.concatenate([z, mu, sigma], axis=-1)


# --------------------------------------------------------------------------
# Param prep (done ONCE, outside the forward)
# --------------------------------------------------------------------------
def prepare_encoder_params(raw, latent_dim, weight_dtype=jnp.float32):
    """Fuse + lane-pad the head weights once so the forward does no param reshuffling."""
    lpad = _round_up(latent_dim, 128)

    def pad_cols(w):
        return jnp.pad(w, ((0, 0), (0, lpad - w.shape[1])))

    w_head = jnp.concatenate([pad_cols(raw["wmu"]), pad_cols(raw["wlv"])], axis=1)  # (H2, 2*lpad)
    b_head = jnp.concatenate([pad_cols(raw["bmu"]), pad_cols(raw["blv"])], axis=1)  # (1,  2*lpad)

    return {
        "w0": raw["w0"].astype(weight_dtype),
        "b0": raw["b0"].astype(jnp.float32),
        "w1": raw["w1"].astype(weight_dtype),
        "b1": raw["b1"].astype(jnp.float32),
        "w_head": w_head.astype(weight_dtype),
        "b_head": b_head.astype(jnp.float32),
        "latent_dim": latent_dim,
        "lpad": lpad,
    }


# --------------------------------------------------------------------------
# Tile selection with a VMEM budget check
# --------------------------------------------------------------------------
def _select_batch_tile(B, batch_tile, d_in, h1, h2, lpad, w_itemsize):
    # Resident weights/biases (default BlockSpec pipeline double-buffers them).
    weight_bytes = 2 * (w_itemsize * (d_in * h1 + h1 * h2 + h2 * 2 * lpad)
                        + 4 * (h1 + h2 + 2 * lpad))
    if weight_bytes > _VMEM_BUDGET_BYTES // 2:
        # TODO(synk): K-tiled fallback (grid over the reduction dims + f32
        # accumulator scratch) for very large hidden sizes.
        raise NotImplementedError(
            "VMEM-resident weights exceed the budget; K-tiled fallback not implemented.")

    if B <= 16:
        tb = B
    else:
        # >= 2 grid steps whenever it is worth splitting, so ("parallel",)
        # can shard the batch across v7x's two TensorCores.
        tb = min(batch_tile, _round_up(pl.cdiv(B, 2), 8))

    def estimate(t):
        stream = 2 * 4 * t * (d_in + lpad + 3 * lpad)        # x / eps / out, double-buffered
        interm = 4 * t * (h1 + h2 + 2 * lpad + 3 * lpad)     # in-kernel activations (f32)
        return weight_bytes + stream + interm

    while tb > 8 and estimate(tb) > _VMEM_BUDGET_BYTES:
        tb = max(8, _round_up(tb // 2, 8))
    return tb


# --------------------------------------------------------------------------
# Forward
# --------------------------------------------------------------------------
def encoder_forward(x, prep, eps, *, batch_tile=512):
    """x: (B, input_size) f32. prep: output of prepare_encoder_params. eps: (B, latent_dim)."""
    B, d_in = x.shape
    h1 = prep["w0"].shape[1]
    h2 = prep["w1"].shape[1]
    L = prep["latent_dim"]
    lpad = prep["lpad"]
    w_itemsize = jnp.dtype(prep["w0"].dtype).itemsize

    # Lane-pad eps once so the in-kernel reparameterization is full-width.
    if lpad > L:
        eps = jnp.pad(eps, ((0, 0), (0, lpad - L)))

    tb = _select_batch_tile(B, batch_tile, d_in, h1, h2, lpad, w_itemsize)
    grid = (pl.cdiv(B, tb),)

    # Weights/biases: constant index_map -> stay VMEM-resident across tiles.
    # TODO(synk): single-buffer these via pipeline_mode=pl.Buffered(1) once
    # verified on the target jax build (halves resident-weight VMEM on v7x).
    def resident(shape):
        return pl.BlockSpec(shape, lambda i: (0, 0))

    def batched(shape):      # per-batch-tile streamed operands
        return pl.BlockSpec(shape, lambda i: (i, 0))

    flops = 2 * B * (d_in * h1 + h1 * h2 + h2 * 2 * lpad)
    transcendentals = 3 * B * lpad
    bytes_accessed = (4 * (x.size + eps.size + B * 3 * lpad)
                      + w_itemsize * (prep["w0"].size + prep["w1"].size + prep["w_head"].size)
                      + 4 * (prep["b0"].size + prep["b1"].size + prep["b_head"].size))

    packed = pl.pallas_call(
        functools.partial(encoder_kernel, lpad=lpad),
        out_shape=jax.ShapeDtypeStruct((B, 3 * lpad), jnp.float32),
        grid=grid,
        in_specs=[
            batched((tb, d_in)),                       # x
            resident((d_in, h1)), resident((1, h1)),   # w0, b0
            resident((h1, h2)), resident((1, h2)),     # w1, b1
            resident((h2, 2 * lpad)),                  # fused+padded head weight
            resident((1, 2 * lpad)),                   # fused+padded head bias
            batched((tb, lpad)),                       # eps (padded)
        ],
        out_specs=batched((tb, 3 * lpad)),
        compiler_params=pltpu.CompilerParams(
            dimension_semantics=("parallel",),
            vmem_limit_bytes=_VMEM_LIMIT_BYTES),
        cost_estimate=pl.CostEstimate(
            flops=flops,
            transcendentals=transcendentals,
            bytes_accessed=bytes_accessed),
    )(x,
      prep["w0"], prep["b0"],
      prep["w1"], prep["b1"],
      prep["w_head"], prep["b_head"],
      eps)

    # The three slices below are at 128-aligned offsets; downstream consumers
    # that can work on the packed (B, 3*lpad) slab directly should take
    # `packed` instead to skip these narrow HBM copies.
    z = packed[:, :L]
    mu = packed[:, lpad:lpad + L]
    sigma = packed[:, 2 * lpad:2 * lpad + L]
    return z, mu, sigma


# --------------------------------------------------------------------------
# Init (matches Encoder(input_size, hidden_sizes, latent_dim, False, 0.0))
# --------------------------------------------------------------------------
def xavier_uniform(key, fan_in, fan_out):
    bound = math.sqrt(6.0 / (fan_in + fan_out))
    return jax.random.uniform(key, (fan_in, fan_out), jnp.float32, -bound, bound)  # stored (in, out)


def linear_bias(key, fan_in, fan_out):
    bound = 1.0 / math.sqrt(fan_in)
    return jax.random.uniform(key, (1, fan_out), jnp.float32, -bound, bound)


def init_encoder_params(key, input_size, hidden_sizes, latent_dim):
    assert len(hidden_sizes) == 2, "this script builds a 2-hidden-layer MLP"
    h1, h2 = hidden_sizes
    keys = jax.random.split(key, 8)
    return {
        "w0": xavier_uniform(keys[0], input_size, h1),
        "b0": linear_bias(keys[1], input_size, h1),
        "w1": xavier_uniform(keys[2], h1, h2),
        "b1": linear_bias(keys[3], h1, h2),
        "wmu": xavier_uniform(keys[4], h2, latent_dim),
        "bmu": linear_bias(keys[5], h2, latent_dim),
        "wlv": xavier_uniform(keys[6], h2, latent_dim),
        "blv": linear_bias(keys[7], h2, latent_dim),
    }


def reference_forward(x, params, eps):
    """Pure-JAX reference (mirrors the PyTorch forward)."""
    h = jnp.maximum(x @ params["w0"] + params["b0"], 0.0)
    h = jnp.maximum(h @ params["w1"] + params["b1"], 0.0)
    mu = h @ params["wmu"] + params["bmu"]
    log_var = jax.nn.softplus(h @ params["wlv"] + params["blv"])
    sigma = jnp.exp(log_var / 2.0)
    z = mu + sigma * eps
    return z, mu, sigma


if __name__ == "__main__":
    batch = 8
    input_size = 32
    hidden_sizes = [32, 32]
    latent_dim = 16

    key = jax.random.PRNGKey(0)
    k_params, k_x, k_eps = jax.random.split(key, 3)

    raw_params = init_encoder_params(k_params, input_size, hidden_sizes, latent_dim)
    # Head fusion + lane padding done once here (f32 for the tight correctness
    # check; pass weight_dtype=jnp.bfloat16 on v6e/v7x for halved weight traffic).
    prep = prepare_encoder_params(raw_params, latent_dim, weight_dtype=jnp.float32)

    x = jax.random.normal(k_x, (batch, input_size), jnp.float32)
    # torch.randn(mu.shape) equivalent, drawn deterministically in glue code.
    eps = jax.random.normal(k_eps, (batch, latent_dim), jnp.float32)

    z, mu, sigma = encoder_forward(x, prep, eps)
    jax.block_until_ready((z, mu, sigma))

    z_ref, mu_ref, sigma_ref = reference_forward(x, raw_params, eps)
    assert jnp.allclose(z, z_ref, atol=1e-5, rtol=1e-5)
    assert jnp.allclose(mu, mu_ref, atol=1e-5, rtol=1e-5)
    assert jnp.allclose(sigma, sigma_ref, atol=1e-5, rtol=1e-5)

    print("KERNEL_OK")
</pallas_src>

<mosaic_0001>
module attributes {stable_mosaic.version = 11 : i64} {
  func.func @encoder_kernel(%arg0: i32, %arg1: memref<8x32xf32, #tpu.memory_space<vmem>>, %arg2: memref<32x32xf32, #tpu.memory_space<vmem>>, %arg3: memref<1x32xf32, #tpu.memory_space<vmem>>, %arg4: memref<32x32xf32, #tpu.memory_space<vmem>>, %arg5: memref<1x32xf32, #tpu.memory_space<vmem>>, %arg6: memref<32x256xf32, #tpu.memory_space<vmem>>, %arg7: memref<1x256xf32, #tpu.memory_space<vmem>>, %arg8: memref<8x128xf32, #tpu.memory_space<vmem>>, %arg9: memref<8x384xf32, #tpu.memory_space<vmem>>) attributes {dimension_semantics = [#tpu.dimension_semantics<parallel>], iteration_bounds = array<i64: 1>, scalar_prefetch = 0 : i64, scratch_operands = 0 : i64, tpu.core_type = #tpu.core_type<tc>, window_params = [{transform_indices = @transform_0, window_bounds = array<i64: 8, 32>}, {pipeline_mode = #tpu.pipeline_mode<synchronous>, transform_indices = @transform_1, window_bounds = array<i64: 32, 32>}, {pipeline_mode = #tpu.pipeline_mode<synchronous>, transform_indices = @transform_2, window_bounds = array<i64: 1, 32>}, {pipeline_mode = #tpu.pipeline_mode<synchronous>, transform_indices = @transform_3, window_bounds = array<i64: 32, 32>}, {pipeline_mode = #tpu.pipeline_mode<synchronous>, transform_indices = @transform_4, window_bounds = array<i64: 1, 32>}, {pipeline_mode = #tpu.pipeline_mode<synchronous>, transform_indices = @transform_5, window_bounds = array<i64: 32, 256>}, {pipeline_mode = #tpu.pipeline_mode<synchronous>, transform_indices = @transform_6, window_bounds = array<i64: 1, 256>}, {transform_indices = @transform_7, window_bounds = array<i64: 8, 128>}, {transform_indices = @transform_8, window_bounds = array<i64: 8, 384>}]} {
    %c0 = arith.constant 0 : index
    %c0_0 = arith.constant 0 : index
    %0 = vector.load %arg1[%c0, %c0_0] : memref<8x32xf32, #tpu.memory_space<vmem>>, vector<8x32xf32>
    %c0_1 = arith.constant 0 : index
    %c0_2 = arith.constant 0 : index
    %1 = vector.load %arg2[%c0_1, %c0_2] : memref<32x32xf32, #tpu.memory_space<vmem>>, vector<32x32xf32>
    %cst = arith.constant dense<0.000000e+00> : vector<8x32xf32>
    %2 = tpu.matmul %0, %1, %cst {dimension_numbers = #tpu.dot_dimension_numbers<[1], [0], [0], [1], [0, 0, 1, 1], [], []>} : vector<8x32xf32>, vector<32x32xf32>, vector<8x32xf32> -> vector<8x32xf32>
    %c0_3 = arith.constant 0 : index
    %c0_4 = arith.constant 0 : index
    %3 = vector.load %arg3[%c0_3, %c0_4] : memref<1x32xf32, #tpu.memory_space<vmem>>, vector<1x32xf32>
    %4 = vector.broadcast %3 : vector<1x32xf32> to vector<8x32xf32>
    %5 = arith.addf %2, %4 : vector<8x32xf32>
    %cst_5 = arith.constant 0.000000e+00 : f32
    %6 = vector.broadcast %cst_5 : f32 to vector<8x32xf32>
    %7 = arith.maximumf %5, %6 : vector<8x32xf32>
    %c0_6 = arith.constant 0 : index
    %c0_7 = arith.constant 0 : index
    %8 = vector.load %arg4[%c0_6, %c0_7] : memref<32x32xf32, #tpu.memory_space<vmem>>, vector<32x32xf32>
    %cst_8 = arith.constant dense<0.000000e+00> : vector<8x32xf32>
    %9 = tpu.matmul %7, %8, %cst_8 {dimension_numbers = #tpu.dot_dimension_numbers<[1], [0], [0], [1], [0, 0, 1, 1], [], []>} : vector<8x32xf32>, vector<32x32xf32>, vector<8x32xf32> -> vector<8x32xf32>
    %c0_9 = arith.constant 0 : index
    %c0_10 = arith.constant 0 : index
    %10 = vector.load %arg5[%c0_9, %c0_10] : memref<1x32xf32, #tpu.memory_space<vmem>>, vector<1x32xf32>
    %11 = vector.broadcast %10 : vector<1x32xf32> to vector<8x32xf32>
    %12 = arith.addf %9, %11 : vector<8x32xf32>
    %cst_11 = arith.constant 0.000000e+00 : f32
    %13 = vector.broadcast %cst_11 : f32 to vector<8x32xf32>
    %14 = arith.maximumf %12, %13 : vector<8x32xf32>
    %c0_12 = arith.constant 0 : index
    %c0_13 = arith.constant 0 : index
    %15 = vector.load %arg6[%c0_12, %c0_13] : memref<32x256xf32, #tpu.memory_space<vmem>>, vector<32x256xf32>
    %cst_14 = arith.constant dense<0.000000e+00> : vector<8x256xf32>
    %16 = tpu.matmul %14, %15, %cst_14 {dimension_numbers = #tpu.dot_dimension_numbers<[1], [0], [0], [1], [0, 0, 1, 1], [], []>} : vector<8x32xf32>, vector<32x256xf32>, vector<8x256xf32> -> vector<8x256xf32>
    %c0_15 = arith.constant 0 : index
    %c0_16 = arith.constant 0 : index
    %17 = vector.load %arg7[%c0_15, %c0_16] : memref<1x256xf32, #tpu.memory_space<vmem>>, vector<1x256xf32>
    %18 = vector.broadcast %17 : vector<1x256xf32> to vector<8x256xf32>
    %19 = arith.addf %16, %18 : vector<8x256xf32>
    %20 = vector.extract_strided_slice %19 {offsets = [0, 0], sizes = [8, 128], strides = [1, 1]} : vector<8x256xf32> to vector<8x128xf32>
    %21 = vector.extract_strided_slice %19 {offsets = [0, 128], sizes = [8, 128], strides = [1, 1]} : vector<8x256xf32> to vector<8x128xf32>
    %cst_17 = arith.constant 0.000000e+00 : f32
    %22 = vector.broadcast %cst_17 : f32 to vector<8x128xf32>
    %23 = arith.maximumf %21, %22 : vector<8x128xf32>
    %24 = math.absf %21 : vector<8x128xf32>
    %cst_18 = arith.constant 0.000000e+00 : f32
    %25 = vector.broadcast %cst_18 : f32 to vector<8x128xf32>
    %26 = arith.subf %25, %24 : vector<8x128xf32>
    %27 = math.exp %26 : vector<8x128xf32>
    %28 = math.log1p %27 : vector<8x128xf32>
    %29 = arith.addf %23, %28 : vector<8x128xf32>
    %cst_19 = arith.constant 5.000000e-01 : f32
    %30 = vector.broadcast %cst_19 : f32 to vector<8x128xf32>
    %31 = arith.mulf %29, %30 : vector<8x128xf32>
    %32 = math.exp %31 : vector<8x128xf32>
    %c0_20 = arith.constant 0 : index
    %c0_21 = arith.constant 0 : index
    %33 = vector.load %arg8[%c0_20, %c0_21] : memref<8x128xf32, #tpu.memory_space<vmem>>, vector<8x128xf32>
    %34 = arith.mulf %32, %33 : vector<8x128xf32>
    %35 = arith.addf %20, %34 : vector<8x128xf32>
    %36 = tpu.concatenate %35, %20, %32 in 1 : vector<8x128xf32>, vector<8x128xf32>, vector<8x128xf32> -> vector<8x384xf32>
    %c0_22 = arith.constant 0 : index
    %c0_23 = arith.constant 0 : index
    %37 = vector.load %arg9[%c0_22, %c0_23] : memref<8x384xf32, #tpu.memory_space<vmem>>, vector<8x384xf32>
    tpu.vector_store %arg9[%c0_22, %c0_23], %36 {strides = array<i32>} : memref<8x384xf32, #tpu.memory_space<vmem>>, vector<8x384xf32>,
    return
  }
  func.func @transform_0(%arg0: i32) -> (i32, i32) {
    %c0_i32 = arith.constant 0 : i32
    %c0_i32_0 = arith.constant 0 : i32
    return %arg0, %c0_i32 : i32, i32
  }
  func.func @transform_1(%arg0: i32) -> (i32, i32) {
    %c0_i32 = arith.constant 0 : i32
    %c0_i32_0 = arith.constant 0 : i32
    %c0_i32_1 = arith.constant 0 : i32
    return %c0_i32, %c0_i32_0 : i32, i32
  }
  func.func @transform_2(%arg0: i32) -> (i32, i32) {
    %c0_i32 = arith.constant 0 : i32
    %c0_i32_0 = arith.constant 0 : i32
    %c0_i32_1 = arith.constant 0 : i32
    return %c0_i32, %c0_i32_0 : i32, i32
  }
  func.func @transform_3(%arg0: i32) -> (i32, i32) {
    %c0_i32 = arith.constant 0 : i32
    %c0_i32_0 = arith.constant 0 : i32
    %c0_i32_1 = arith.constant 0 : i32
    return %c0_i32, %c0_i32_0 : i32, i32
  }
  func.func @transform_4(%arg0: i32) -> (i32, i32) {
    %c0_i32 = arith.constant 0 : i32
    %c0_i32_0 = arith.constant 0 : i32
    %c0_i32_1 = arith.constant 0 : i32
    return %c0_i32, %c0_i32_0 : i32, i32
  }
  func.func @transform_5(%arg0: i32) -> (i32, i32) {
    %c0_i32 = arith.constant 0 : i32
    %c0_i32_0 = arith.constant 0 : i32
    %c0_i32_1 = arith.constant 0 : i32
    return %c0_i32, %c0_i32_0 : i32, i32
  }
  func.func @transform_6(%arg0: i32) -> (i32, i32) {
    %c0_i32 = arith.constant 0 : i32
    %c0_i32_0 = arith.constant 0 : i32
    %c0_i32_1 = arith.constant 0 : i32
    return %c0_i32, %c0_i32_0 : i32, i32
  }
  func.func @transform_7(%arg0: i32) -> (i32, i32) {
    %c0_i32 = arith.constant 0 : i32
    %c0_i32_0 = arith.constant 0 : i32
    return %arg0, %c0_i32 : i32, i32
  }
  func.func @transform_8(%arg0: i32) -> (i32, i32) {
    %c0_i32 = arith.constant 0 : i32
    %c0_i32_0 = arith.constant 0 : i32
    return %arg0, %c0_i32 : i32, i32
  }
}

</mosaic_0001>

<bundles_post_ra>
// kernel: tpu_custom_call.1
= control target key start
LH: loop header
LB: loop body
LE: loop exit
PB: predicated region body
PF: predicated region fallthrough
CT: control target
= control target key end

     0   :  { %13 = vsyncpa [#allocation3], 0  ;;  %s899_s0 = inlined_call_operand.hbm [shape: f32[8,32], index: 0, kind: input, shape index: {}]   ;;  %s900_s1 = inlined_call_operand.hbm [shape: f32[32,32], index: 1, kind: input, shape index: {}]   ;;  %s901_s2 = inlined_call_operand.hbm [shape: f32[1,32], index: 2, kind: input, shape index: {}]   ;;  %s902_s3 = inlined_call_operand.hbm [shape: f32[32,32], index: 3, kind: input, shape index: {}]   ;;  %s903_s4 = inlined_call_operand.hbm [shape: f32[1,32], index: 4, kind: input, shape index: {}]   ;;  %s904_s5 = inlined_call_operand.hbm [shape: f32[32,256], index: 5, kind: input, shape index: {}]   ;;  %s905_s6 = inlined_call_operand.hbm [shape: f32[1,256], index: 6, kind: input, shape index: {}]   ;;  %s906_s7 = inlined_call_operand.hbm [shape: f32[8,128], index: 7, kind: input, shape index: {}]   ;;  %s907_s8 = inlined_call_operand.hbm [shape: f32[8,384], index: 8, kind: output, shape index: {}]  }
   0x1   :  { %14 = vsyncpa [#allocation6], 0 }
   0x2   :  { %15 = vsyncpa [#allocation9], 0 }
   0x3   :  { %16 = vsyncpa [#allocation12], 0 }
   0x4   :  { %17 = vsyncpa [#allocation15], 0 }
   0x5   :  { %18 = vsyncpa [#allocation4], 0  ;;  %s727_s27 = smov [#allocation5]   ;;  %s517_s9 = scalar_lea.hbm %s900_s1, 512 }
   0x6   :  { %s34_s28 = sshll.u32 %s727_s27, 4  ;;  %p518_p0 = scmp.ne.s32.totalorder %s900_s1, %s517_s9  ;;  %s35_s28 = int_to_ptr.vmem [resolvable:$true] %s34_s28 }
   0x7   :  { %p521_p1 = scmp.lt.u32.totalorder %s517_s9, %s900_s1 }
   0x9   :  { %p523_p2 = pnand %p521_p1, %p518_p0 }
   0xb   :  { %526 = shalt.err (!%p523_p2)
}
   0xc   :  { %s527_s14 = scalar_lea.vmem %s35_s28, 512  ;;  %p532_p4 = scmp.lt.s32.totalorder %s35_s28, %s35_s28 }
   0xd   :  { %p528_p3 = scmp.ne.s32.totalorder %s35_s28, %s527_s14  ;;  %p533_p5 = scmp.lt.s32.totalorder %s527_s14, %s527_s14 }
   0xf   :  { %p534_p6 = por %p533_p5, %p532_p4 }
  0x11   :  { %p535_p7 = pnand %p534_p6, %p528_p3 }
  0x13   :  { %538 = shalt.err (!%p535_p7)
}
  0x14   :  { %s728_s15 = smov 128   ;;  %s729_s16 = smov 8  }
  0x15   :  { %40 = dma.hbm_to_vmem [thread:$0]  %s900_s1, 512, %s35_s28, [#allocation6], %s728_s15, %s728_s15, %s729_s16  }
  0x16   :  { %s730_s19 = smov [#allocation8]   ;;  %s731_s21 = smov [#allocation11]  }
  0x17   :  { %s56_s20 = sshll.u32 %s730_s19, 4  ;;  %s78_s22 = sshll.u32 %s731_s21, 4  ;;  %s57_s20 = int_to_ptr.vmem [resolvable:$true] %s56_s20  ;;  %s79_s22 = int_to_ptr.vmem [resolvable:$true] %s78_s22 }
  0x18   :  { %s539_s25 = scalar_lea.hbm %s902_s3, 512 }
  0x19   :  { %p540_p8 = scmp.ne.s32.totalorder %s902_s3, %s539_s25  ;;  %p543_p9 = scmp.lt.u32.totalorder %s539_s25, %s902_s3 }
  0x1b   :  { %p545_p10 = pnand %p543_p9, %p540_p8 }
  0x1d   :  { %548 = shalt.err (!%p545_p10)
}
  0x1e   :  { %s549_s1 = scalar_lea.vmem %s57_s20, 512  ;;  %p554_p12 = scmp.lt.s32.totalorder %s57_s20, %s57_s20 }
  0x1f   :  { %p550_p11 = scmp.ne.s32.totalorder %s57_s20, %s549_s1  ;;  %p555_p13 = scmp.lt.s32.totalorder %s549_s1, %s549_s1 }
  0x21   :  { %p556_p0 = por %p555_p13, %p554_p12 }
  0x23   :  { %p557_p1 = pnand %p556_p0, %p550_p11 }
  0x25   :  { %560 = shalt.err (!%p557_p1)
}
  0x26   :  { %62 = dma.hbm_to_vmem [thread:$0]  %s902_s3, 512, %s57_s20, [#allocation9], %s728_s15, %s728_s15, %s729_s16  }
  0x27   :  { %s561_s12 = scalar_lea.hbm %s904_s5, 1024 }
  0x28   :  { %p562_p2 = scmp.ne.s32.totalorder %s904_s5, %s561_s12  ;;  %p565_p3 = scmp.lt.u32.totalorder %s561_s12, %s904_s5 }
  0x2a   :  { %p567_p4 = pnand %p565_p3, %p562_p2 }
  0x2c   :  { %570 = shalt.err (!%p567_p4)
}
  0x2d   :  { %s571_s19 = scalar_lea.vmem %s79_s22, 1024  ;;  %p576_p6 = scmp.lt.s32.totalorder %s79_s22, %s79_s22 }
  0x2e   :  { %p572_p5 = scmp.ne.s32.totalorder %s79_s22, %s571_s19  ;;  %p577_p7 = scmp.lt.s32.totalorder %s571_s19, %s571_s19 }
  0x30   :  { %p578_p8 = por %p577_p7, %p576_p6 }
  0x32   :  { %p579_p9 = pnand %p578_p8, %p572_p5 }
  0x34   :  { %582 = shalt.err (!%p579_p9)
}
  0x35   :  { %s732_s3 = smov 256   ;;  %s733_s15 = smov 16  }
  0x36   :  { %84 = dma.hbm_to_vmem [thread:$0]  %s904_s5, 1024, %s79_s22, [#allocation12], %s732_s3, %s732_s3, %s733_s15  }
  0x37   :  { %s734_s21 = smov [#allocation2]   ;;  %s735_s24 = smov [#allocation7]  }
  0x38   :  { %s25_s23 = sshll.u32 %s734_s21, 4  ;;  %s47_s25 = sshll.u32 %s735_s24, 4  ;;  %s26_s23 = int_to_ptr.vmem [resolvable:$true] %s25_s23  ;;  %s48_s25 = int_to_ptr.vmem [resolvable:$true] %s47_s25 }
  0x39   :  { %s583_s29 = scalar_lea.hbm %s899_s0, 128 }
  0x3a   :  { %p584_p10 = scmp.ne.s32.totalorder %s899_s0, %s583_s29  ;;  %p587_p11 = scmp.lt.u32.totalorder %s583_s29, %s899_s0 }
  0x3c   :  { %p589_p12 = pnand %p587_p11, %p584_p10 }
  0x3e   :  { %592 = shalt.err (!%p589_p12)
}
  0x3f   :  { %s593_s5 = scalar_lea.vmem %s26_s23, 128  ;;  %p598_p0 = scmp.lt.s32.totalorder %s26_s23, %s26_s23 }
  0x40   :  { %p594_p13 = scmp.ne.s32.totalorder %s26_s23, %s593_s5  ;;  %p599_p1 = scmp.lt.s32.totalorder %s593_s5, %s593_s5 }
  0x42   :  { %p600_p2 = por %p599_p1, %p598_p0 }
  0x44   :  { %p601_p3 = pnand %p600_p2, %p594_p13 }
  0x46   :  { %604 = shalt.err (!%p601_p3)
}
  0x47   :  { %28 = dma.hbm_to_vmem [thread:$0]  %s899_s0, 128, %s26_s23, [#allocation3]  }
  0x48   :  { %s605_s13 = scalar_lea.hbm %s901_s2, 16 }
  0x49   :  { %p606_p4 = scmp.ne.s32.totalorder %s901_s2, %s605_s13  ;;  %p609_p5 = scmp.lt.u32.totalorder %s605_s13, %s901_s2 }
  0x4b   :  { %p611_p6 = pnand %p609_p5, %p606_p4 }
  0x4d   :  { %614 = shalt.err (!%p611_p6)
}
  0x4e   :  { %s615_s3 = scalar_lea.vmem %s48_s25, 16  ;;  %s619_s15 = scalar_lea.vmem %s48_s25, 32 }
  0x4f   :  { %p616_p7 = scmp.ne.s32.totalorder %s48_s25, %s615_s3  ;;  %p620_p8 = scmp.lt.s32.totalorder %s48_s25, %s48_s25 }
  0x50   :  { %p621_p9 = scmp.lt.s32.totalorder %s619_s15, %s615_s3 }
  0x52   :  { %p622_p10 = por %p621_p9, %p620_p8 }
  0x54   :  { %p623_p11 = pnand %p622_p10, %p616_p7 }
  0x56   :  { %626 = shalt.err (!%p623_p11)
}
  0x57   :  { %50 = dma.hbm_to_vmem [thread:$0]  %s901_s2, 16, %s48_s25, [#allocation6]  }
  0x58   :  { %s736_s20 = smov [#allocation10]   ;;  %s737_s23 = smov [#allocation13]  }
  0x59   :  { %s69_s21 = sshll.u32 %s736_s20, 4  ;;  %s91_s24 = sshll.u32 %s737_s23, 4  ;;  %s70_s21 = int_to_ptr.vmem [resolvable:$true] %s69_s21  ;;  %s92_s24 = int_to_ptr.vmem [resolvable:$true] %s91_s24 }
  0x5a   :  { %s627_s29 = scalar_lea.hbm %s903_s4, 16 }
  0x5b   :  { %p628_p12 = scmp.ne.s32.totalorder %s903_s4, %s627_s29  ;;  %p631_p13 = scmp.lt.u32.totalorder %s627_s29, %s903_s4 }
  0x5d   :  { %p633_p0 = pnand %p631_p13, %p628_p12 }
  0x5f   :  { %636 = shalt.err (!%p633_p0)
}
  0x60   :  { %s637_s2 = scalar_lea.vmem %s70_s21, 16  ;;  %s641_s25 = scalar_lea.vmem %s70_s21, 32 }
  0x61   :  { %p638_p1 = scmp.ne.s32.totalorder %s70_s21, %s637_s2  ;;  %p642_p2 = scmp.lt.s32.totalorder %s70_s21, %s70_s21 }
  0x62   :  { %p643_p3 = scmp.lt.s32.totalorder %s641_s25, %s637_s2 }
  0x64   :  { %p644_p4 = por %p643_p3, %p642_p2 }
  0x66   :  { %p645_p5 = pnand %p644_p4, %p638_p1 }
  0x68   :  { %648 = shalt.err (!%p645_p5)
}
  0x69   :  { %72 = dma.hbm_to_vmem [thread:$0]  %s903_s4, 16, %s70_s21, [#allocation9]  }
  0x6a   :  { %s649_s12 = scalar_lea.hbm %s905_s6, 32 }
  0x6b   :  { %p650_p6 = scmp.ne.s32.totalorder %s905_s6, %s649_s12  ;;  %p653_p7 = scmp.lt.u32.totalorder %s649_s12, %s905_s6 }
  0x6d   :  { %p655_p8 = pnand %p653_p7, %p650_p6 }
  0x6f   :  { %658 = shalt.err (!%p655_p8)
}
  0x70   :  { %s659_s19 = scalar_lea.vmem %s92_s24, 32  ;;  %p664_p10 = scmp.lt.s32.totalorder %s92_s24, %s92_s24 }
  0x71   :  { %p660_p9 = scmp.ne.s32.totalorder %s92_s24, %s659_s19  ;;  %p665_p11 = scmp.lt.s32.totalorder %s659_s19, %s659_s19 }
  0x73   :  { %p666_p12 = por %p665_p11, %p664_p10 }
  0x75   :  { %p667_p13 = pnand %p666_p12, %p660_p9 }
  0x77   :  { %670 = shalt.err (!%p667_p13)
}
  0x78   :  { %94 = dma.hbm_to_vmem [thread:$0]  %s905_s6, 32, %s92_s24, [#allocation12]  }
  0x79   :  { %s738_s15 = smov [#allocation14]   ;;  %s671_s21 = scalar_lea.hbm %s906_s7, 128 }
  0x7a   :  { %s101_s0 = sshll.u32 %s738_s15, 4  ;;  %p672_p0 = scmp.ne.s32.totalorder %s906_s7, %s671_s21  ;;  %s102_s0 = int_to_ptr.vmem [resolvable:$true] %s101_s0 }
  0x7b   :  { %p675_p1 = scmp.lt.u32.totalorder %s671_s21, %s906_s7 }
  0x7d   :  { %p677_p2 = pnand %p675_p1, %p672_p0 }
  0x7f   :  { %680 = shalt.err (!%p677_p2)
}
  0x80   :  { %s681_s30 = scalar_lea.vmem %s102_s0, 128  ;;  %p686_p4 = scmp.lt.s32.totalorder %s102_s0, %s102_s0 }
  0x81   :  { %p682_p3 = scmp.ne.s32.totalorder %s102_s0, %s681_s30  ;;  %p687_p5 = scmp.lt.s32.totalorder %s681_s30, %s681_s30 }
  0x83   :  { %p688_p6 = por %p687_p5, %p686_p4 }
  0x85   :  { %p689_p7 = pnand %p688_p6, %p682_p3 }
  0x87   :  { %692 = shalt.err (!%p689_p7)
}
  0x88   :  { %104 = dma.hbm_to_vmem [thread:$0]  %s906_s7, 128, %s102_s0, [#allocation15]  }
  0x89   :  { %715 = dma.done.wait [#allocation3], 128  }
  0x8a   :  { %716 = vsyncadd [#allocation3], 4294967168 }
  0x8b   :  { %717 = dma.done.wait [#allocation6], 528  }
  0x8c   :  { %718 = vsyncadd [#allocation6], 4294966768 }
  0x8d   :  { %719 = dma.done.wait [#allocation9], 528  }
  0x8e   :  { %720 = vsyncadd [#allocation9], 4294966768 }
  0x8f   :  { %721 = dma.done.wait [#allocation12], 1056  }
  0x90   :  { %722 = vsyncadd [#allocation12], 4294966240 }
  0x91   :  { %723 = dma.done.wait [#allocation15], 128  }
  0x92   :  { %724 = vsyncadd [#allocation15], 4294967168  ;;  %v739_v0 = vmov 0.0|0.0   ;;  %vm740_vm0 = vmmov 0   ;;  %v741_v1 = vmov 0.0   ;;  %v130_v2 = vld [vmem:[#allocation5] sm:$0xff]  ;;  %v311_v37 = vlaneseq }
  0x93   :  { %475 = vmatprep.subr.bf16.mxu0 %v739_v0  ;;  %461 = vmatprep.mubr.msk.f32.mxu0 %vm740_vm0, %v741_v1  ;;  %v131_v3 = vld [vmem:[#allocation5 + $0x8] sm:$0xff]  ;;  %v132_v4 = vld [vmem:[#allocation5 + $0x10] sm:$0xff]  ;;  %v133_v6 = vld [vmem:[#allocation5 + $0x18] sm:$0xff]  ;;  %vm141_vm1 = vcmask 261120   ;;  %s742_s7 = smov [#allocation16]  }
  0x94   :  { %481 = vmatprep.subr.bf16.mxu1 %v739_v0  ;;  %472 = vmatprep.mubr.msk.f32.mxu1 %vm740_vm0, %v741_v1  ;;  %v476_v5 = vpack.c.bf16 %v131_v3, %v130_v2  ;;  %v216_v7 = vld [vmem:[#allocation8] sm:$0xff]  ;;  %v217_v8 = vld [vmem:[#allocation8 + $0x8] sm:$0xff]  ;;  %v479_v9 = vpack.c.bf16 %v133_v6, %v132_v4  ;;  %v129_v11 = vld [vmem:[#allocation2] sm:$0xff]  ;;  %v312_v38 = vshrl.u32 %v311_v37, 7  ;;  %s425_s1 = sshll.u32 %s742_s7, 4  ;;  %s426_s1 = int_to_ptr.vmem [resolvable:$true] %s425_s1 }
  0x95   :  { %v482_v10 = vpack.c.bf16 %v217_v8, %v216_v7  ;;  %v218_v12 = vld [vmem:[#allocation8 + $0x10] sm:$0xff]  ;;  %v219_v13 = vld [vmem:[#allocation8 + $0x18] sm:$0xff]  ;;  %v301_v17 = vld [vmem:[#allocation11] sm:$0xff]  ;;  %s693_s28 = scalar_lea.vmem %s426_s1, 384  ;;  %p698_p9 = scmp.lt.s32.totalorder %s426_s1, %s426_s1 }
  0x96   :  { %477 = vmatpush3.bf16.msra.mxu0 %v476_v5  ;;  %v485_v14 = vpack.c.bf16 %v219_v13, %v218_v12  ;;  %v302_v15 = vld [vmem:[#allocation11 + $0x8] sm:$0xff]  ;;  %v304_v16 = vld [vmem:[#allocation11 + $0x18] sm:$0xff]  ;;  %v303_v19 = vld [vmem:[#allocation11 + $0x10] sm:$0xff]  ;;  %v313_v39 = vsub.s32 0, %v312_v38  ;;  %v317_v41 = vsub.s32 1, %v312_v38  ;;  %p694_p8 = scmp.ne.s32.totalorder %s426_s1, %s693_s28  ;;  %p699_p10 = scmp.lt.s32.totalorder %s693_s28, %s693_s28 }
  0x97   :  { %478 = vmatprep.subr.bf16.mxu0 %v739_v0  ;;  %483 = vmatpush3.bf16.msra.mxu1 %v482_v10  ;;  %v487_v18 = vpack.c.bf16 %v304_v16, %v302_v15  ;;  %v489_v20 = vpack.c.bf16 %v303_v19, %v301_v17  ;;  %v438_v21 = vld [vmem:[#allocation7] ss:$0 sm:$0xff]  ;;  %v306_v26 = vld [vmem:[#allocation11 + $0x28] sm:$0xff]  ;;  %v305_v29 = vld [vmem:[#allocation11 + $0x20] sm:$0xff] }
  0x98   :  { %484 = vmatprep.subr.bf16.mxu1 %v739_v0  ;;  %v308_v27 = vld [vmem:[#allocation11 + $0x38] sm:$0xff]  ;;  %v307_v30 = vld [vmem:[#allocation11 + $0x30] sm:$0xff]  ;;  %v309_v40 = vld [vmem:[#allocation13] sm:$0x3]  ;;  %p700_p11 = por %p699_p10, %p698_p9 }
  0x99   :  { %v491_v28 = vpack.c.bf16 %v308_v27, %v306_v26  ;;  %v493_v31 = vpack.c.bf16 %v307_v30, %v305_v29  ;;  %v440_v32 = vld [vmem:[#allocation10] ss:$0 sm:$0xff]  ;;  %v314_v42 = vrot.slane %v309_v40, %v313_v39  ;;  %v318_v43 = vrot.slane %v309_v40, %v317_v41  ;;  %v413_v0 = vld [vmem:[#allocation14] sm:$0xff] }
  0x9a   :  { %480 = vmatpush3.bf16.msra.mxu0 %v479_v9  ;;  %p701_p12 = pnand %p700_p11, %p694_p8 }
  0x9b   :  { %486 = vmatpush3.bf16.msra.mxu1 %v485_v14  ;;  %488 = vmatprep.subr.bf16.mxu0 %v487_v18 }
  0x9d   :  { %462 = vmatmul.mubr.msk.f32.vlgmr.msra.gmra.mrb[0].mxu0 %vm141_vm1, %v129_v11 }
  0x9e   :  { %388 = vmatprep.mubr.f32.mxu0 %v741_v1  ;;  %490 = vmatpush1.bf16.msra.mxu0 %v489_v20 }
  0x9f   :  { %492 = vmatprep.subr.bf16.mxu0 %v491_v28 }
  0xa2   :  { %494 = vmatpush1.bf16.msra.mxu0 %v493_v31 }
 0x170   :  { %v211_v22 = vpop.f32.mrb[0].mxu0 }
 0x171   :  { %v212_v23 = vadd.f32 %v438_v21, %v211_v22  ;;  %v463_v24 = vpop.f32.mrb[1].mxu0 }
 0x173   :  { %v215_v25 = vmax.f32 %v212_v23, 0.0 }
 0x175   :  { %473 = vmatmul.mubr.msk.f32.vlgmr.msra.gmra.mrb[0].mxu1 %vm141_vm1, %v215_v25 }
 0x248   :  { %v296_v33 = vpop.f32.mrb[0].mxu1 }
 0x249   :  { %v297_v34 = vadd.f32 %v440_v32, %v296_v33  ;;  %v474_v35 = vpop.f32.mrb[1].mxu1 }
 0x24b   :  { %v300_v36 = vmax.f32 %v297_v34, 0.0 }
 0x24d   :  { %442 = vmatmul.mubr.msk.f32.vlgmr.msra.gmra.mrb[2].mxu0 %vm141_vm1, %v300_v36 }
 0x320   :  { %v390_v44 = vpop.f32.mrb[2].mxu0 }
 0x321   :  { %v391_v45 = vadd.f32 %v390_v44, %v314_v42  ;;  %v392_v46 = vpop.f32.mrb[3].mxu0 }
 0x322   :  { %v393_v47 = vadd.f32 %v392_v46, %v318_v43 }
 0x323   :  { %417 = vst [vmem:[#allocation16 + $0x8] sm:$0xff] %v391_v45 }
 0x324   :  { %v396_v48 = vand.u32 2147483647, %v393_v47  ;;  %v395_v59 = vmax.f32 %v393_v47, 0.0 }
 0x326   :  { %v397_v49 = vsub.f32 0.0, %v396_v48 }
 0x328   :  { %v398_v50 = vmul.f32 1.442695, %v397_v49 }
 0x32a   :  { %511 = vpow2.f32 %v398_v50 }
 0x334   :  { %v512_v51 = vpop.eup %511 }
 0x335   :  { %v400_v52 = vadd.f32 1.0, %v512_v51  ;;  %v403_v53 = vmul.f32 -0.5, %v512_v51  ;;  %v406_v55 = vand.u32 2147483647, %v512_v51 }
 0x337   :  { %513 = vlog2.f32 %v400_v52  ;;  %v404_v54 = vadd.f32 1.0, %v403_v53  ;;  %vm407_vm2 = vcmp.lt.f32.partialorder %v406_v55, 0.0004427343 }
 0x339   :  { %v405_v58 = vmul.f32 %v512_v51, %v404_v54 }
 0x341   :  { %v514_v56 = vpop.eup %513 }
 0x342   :  { %v402_v57 = vmul.f32 0.6931472, %v514_v56 }
 0x344   :  { %v408_v60 = vsel %vm407_vm2, %v405_v58, %v402_v57 }
 0x345   :  { %v409_v61 = vadd.f32 %v408_v60, %v395_v59 }
 0x347   :  { %v410_v62 = vmul.f32 0.5, %v409_v61 }
 0x349   :  { %v411_v63 = vmul.f32 1.442695, %v410_v62 }
 0x34b   :  { %515 = vpow2.f32 %v411_v63 }
 0x355   :  { %v516_v1 = vpop.eup %515 }
 0x356   :  { %418 = vst [vmem:[#allocation16 + $0x10] sm:$0xff] %v516_v1  ;;  %v414_v2 = vmul.f32 %v516_v1, %v413_v0 }
 0x358   :  { %v415_v3 = vadd.f32 %v414_v2, %v391_v45 }
 0x35a   :  { %416 = vst [vmem:[#allocation16] sm:$0xff] %v415_v3 }
 0x35b   :  { %704 = shalt.err (!%p701_p12)
}
 0x35c   :  { %s705_s25 = scalar_lea.hbm %s907_s8, 384 }
 0x35d   :  { %p706_p13 = scmp.ne.s32.totalorder %s907_s8, %s705_s25  ;;  %p709_p0 = scmp.lt.u32.totalorder %s705_s25, %s907_s8 }
 0x35f   :  { %p711_p1 = pnand %p709_p0, %p706_p13 }
 0x361   :  { %714 = shalt.err (!%p711_p1)
}
 0x362   :  { %428 = dma.vmem_to_hbm [thread:$0]  %s426_s1, 384, %s907_s8, [#allocation4]  }
 0x363   :  { %725 = dma.done.wait [#allocation4], 384  }
 0x364   :  { %726 = vsyncadd [#allocation4], 4294966912 }
 0x365   :  { %432 = vsyncpa [#allocation3], 1 }
 0x366   :  { %433 = vsyncpa [#allocation6], 1 }
 0x367   :  { %434 = vsyncpa [#allocation9], 1 }
 0x368   :  { %435 = vsyncpa [#allocation12], 1 }
 0x369   :  { %436 = vsyncpa [#allocation15], 1 }
 0x36a   :  { %437 = vsyncpa [#allocation4], 1 }

</bundles_post_ra>
